<compile_context>
chip_gen: v5e
topology: v5e:2x2
jax: 0.10.0
libtpu: 0.0.40
codegen_flags: <defaults>
</compile_context>

<pallas_src>
import functools

import jax
import jax.numpy as jnp
from jax.experimental import pallas as pl
from jax.experimental.pallas import tpu as pltpu


def decoder_kernel(z_ref,
                   w1_ref, b1_ref,
                   w2_ref, b2_ref,
                   w3_ref, b3_ref,
                   w4_ref, b4_ref,
                   out_ref):
    # Fused 4-layer MLP for one batch tile. Intermediate activations stay
    # register/VMEM-resident (no scratch round-trips). Dots feed the MXU in
    # bf16 and accumulate in f32.
    h = z_ref[...]                                             # already bf16

    h = jnp.dot(h, w1_ref[...],
                preferred_element_type=jnp.float32) + b1_ref[...]
    h = jnp.maximum(h, 0.0)                                    # ReLU (f32, VPU)

    h = jnp.dot(h.astype(jnp.bfloat16), w2_ref[...],
                preferred_element_type=jnp.float32) + b2_ref[...]
    h = jnp.maximum(h, 0.0)

    h = jnp.dot(h.astype(jnp.bfloat16), w3_ref[...],
                preferred_element_type=jnp.float32) + b3_ref[...]
    h = jnp.maximum(h, 0.0)

    h = jnp.dot(h.astype(jnp.bfloat16), w4_ref[...],
                preferred_element_type=jnp.float32) + b4_ref[...]
    out_ref[...] = h.astype(out_ref.dtype)


def prepare_decoder_params(params):
    """One-time (out-of-forward-path) weight/bias preparation.

    params: list of (W, b) with W of shape (in, out), f32.
    Returns list of (W_bf16, b_f32_2d). Call this once at model init so the
    forward path reads a single cached bf16 copy of every weight from HBM.
    """
    prepped = []
    for w, b in params:
        prepped.append((jnp.asarray(w, jnp.bfloat16),
                        jnp.asarray(b, jnp.float32).reshape(1, -1)))
    return prepped


@functools.partial(jax.jit, static_argnames=("block_m", "out_dtype"))
def decoder_forward(z, prepped_params, *, block_m=256, out_dtype=jnp.float32):
    """Forward pass. `prepped_params` must come from prepare_decoder_params.

    block_m: batch tile; use 128 on v5e (128-wide MXU), 256 on v6e/v7x.
    """
    B, hid_dim = z.shape
    out_dim = prepped_params[-1][0].shape[1]

    # Batch tile + padding so any batch size works (pl.cdiv grid, padded tail).
    tm = B if B <= block_m else block_m
    n_tiles = pl.cdiv(B, tm)
    b_pad = n_tiles * tm

    z_bf16 = z.astype(jnp.bfloat16)                       # cast once, host side
    if b_pad != B:
        z_bf16 = jnp.pad(z_bf16, ((0, b_pad - B), (0, 0)))

    flat_args = [z_bf16]
    in_specs = [pl.BlockSpec((tm, hid_dim), lambda i: (i, 0))]
    weight_bytes = 0
    flops = 0
    for w, b in prepped_params:
        flat_args.append(w)
        # Constant index_map -> weight block stays VMEM-resident across tiles.
        # TODO(synk): on v7x with multi-thousand-wide layers, add
        # pipeline_mode=pl.Buffered(1) here and set vmem_limit_bytes to keep
        # the resident weights under the 64 MiB VMEM ceiling.
        in_specs.append(pl.BlockSpec(w.shape, lambda i: (0, 0)))
        flat_args.append(b)
        in_specs.append(pl.BlockSpec(b.shape, lambda i: (0, 0)))
        weight_bytes += w.size * 2 + b.size * 4
        flops += 2 * b_pad * w.shape[0] * w.shape[1]

    bytes_accessed = (weight_bytes
                      + b_pad * hid_dim * 2                 # bf16 activations in
                      + b_pad * out_dim * jnp.dtype(out_dtype).itemsize)

    # For this weight-DMA-bound MLP, only shard batch tiles across TensorCores
    # when there are enough tiles to amortize duplicated resident-weight DMA.
    semantics = ("parallel",) if n_tiles >= 4 else ("arbitrary",)

    out = pl.pallas_call(
        decoder_kernel,
        out_shape=jax.ShapeDtypeStruct((b_pad, out_dim), out_dtype),
        grid=(n_tiles,),
        in_specs=in_specs,
        out_specs=pl.BlockSpec((tm, out_dim), lambda i: (i, 0)),
        compiler_params=pltpu.CompilerParams(
            dimension_semantics=semantics),
        cost_estimate=pl.CostEstimate(
            flops=flops, transcendentals=0, bytes_accessed=bytes_accessed),
    )(*flat_args)

    if b_pad != B:
        out = out[:B]
    return out


def init_linear(key, in_dim, out_dim):
    # Deterministic init mimicking nn.Linear's uniform(-1/sqrt(in), 1/sqrt(in)).
    kw, kb = jax.random.split(key)
    bound = 1.0 / jnp.sqrt(jnp.asarray(in_dim, jnp.float32))
    w = jax.random.uniform(kw, (in_dim, out_dim), jnp.float32, -bound, bound)
    b = jax.random.uniform(kb, (out_dim,), jnp.float32, -bound, bound)
    return w, b


def reference_forward_f32(z, params):
    # Pure f32 reference (matches the PyTorch module's math).
    h = z
    for i, (w, b) in enumerate(params):
        h = h @ w + b
        if i < len(params) - 1:
            h = jnp.maximum(h, 0.0)
    return h


def reference_forward_bf16(z, params):
    # Reference matching the kernel's precision choices (bf16 matmul inputs,
    # f32 accumulation, f32 bias/ReLU).
    h = z.astype(jnp.bfloat16)
    for i, (w, b) in enumerate(params):
        h = jnp.dot(h, w.astype(jnp.bfloat16),
                    preferred_element_type=jnp.float32) + b.astype(jnp.float32)
        if i < len(params) - 1:
            h = jnp.maximum(h, 0.0)
        if i < len(params) - 1:
            h = h.astype(jnp.bfloat16)
    return h


if __name__ == "__main__":
    # Small shapes consistent with the Decoder MLP structure:
    # hid_dim -> inter_dims[-1] -> inter_dims[-2] -> inter_dims[-3] -> input_dim
    batch = 8
    hid_dim = 32
    inter_dims = [64, 128, 256]
    input_dim = 512

    key = jax.random.PRNGKey(0)
    kz, k1, k2, k3, k4 = jax.random.split(key, 5)

    z = jax.random.normal(kz, (batch, hid_dim), jnp.float32)

    params = [
        init_linear(k1, hid_dim, inter_dims[-1]),         # 32  -> 256, ReLU
        init_linear(k2, inter_dims[-1], inter_dims[-2]),  # 256 -> 128, ReLU
        init_linear(k3, inter_dims[-2], inter_dims[-3]),  # 128 -> 64,  ReLU
        init_linear(k4, inter_dims[-3], input_dim),       # 64  -> 512
    ]

    # One-time preparation (model init): bf16 weights, (1, out) biases.
    prepped = prepare_decoder_params(params)

    out = decoder_forward(z, prepped)
    out = jax.block_until_ready(out)
    assert out.shape == (batch, input_dim)

    # Tight check against a reference with identical precision choices.
    ref_bf16 = reference_forward_bf16(z, params)
    assert jnp.allclose(out, ref_bf16, atol=2e-2, rtol=2e-2)

    # Loose check against the pure-f32 PyTorch-equivalent math (bf16 weight /
    # activation rounding introduces ~1e-2-level relative differences).
    ref_f32 = reference_forward_f32(z, params)
    assert jnp.allclose(out, ref_f32, atol=5e-2, rtol=5e-2)

    # Also exercise the padded-tail path (batch not a multiple of the tile).
    z_odd = jax.random.normal(kz, (5, hid_dim), jnp.float32)
    out_odd = jax.block_until_ready(decoder_forward(z_odd, prepped))
    assert out_odd.shape == (5, input_dim)
    assert jnp.allclose(out_odd, reference_forward_f32(z_odd, params),
                        atol=5e-2, rtol=5e-2)

    print("KERNEL_OK")
</pallas_src>

<mosaic_0001>
module attributes {stable_mosaic.version = 11 : i64} {
  func.func @decoder_kernel(%arg0: i32, %arg1: memref<8x32xbf16, #tpu.memory_space<vmem>>, %arg2: memref<32x256xbf16, #tpu.memory_space<vmem>>, %arg3: memref<1x256xf32, #tpu.memory_space<vmem>>, %arg4: memref<256x128xbf16, #tpu.memory_space<vmem>>, %arg5: memref<1x128xf32, #tpu.memory_space<vmem>>, %arg6: memref<128x64xbf16, #tpu.memory_space<vmem>>, %arg7: memref<1x64xf32, #tpu.memory_space<vmem>>, %arg8: memref<64x512xbf16, #tpu.memory_space<vmem>>, %arg9: memref<1x512xf32, #tpu.memory_space<vmem>>, %arg10: memref<8x512xf32, #tpu.memory_space<vmem>>) attributes {dimension_semantics = [#tpu.dimension_semantics<arbitrary>], iteration_bounds = array<i64: 1>, scalar_prefetch = 0 : i64, scratch_operands = 0 : i64, tpu.core_type = #tpu.core_type<tc>, window_params = [{transform_indices = @transform_0, window_bounds = array<i64: 8, 32>}, {pipeline_mode = #tpu.pipeline_mode<synchronous>, transform_indices = @transform_1, window_bounds = array<i64: 32, 256>}, {pipeline_mode = #tpu.pipeline_mode<synchronous>, transform_indices = @transform_2, window_bounds = array<i64: 1, 256>}, {pipeline_mode = #tpu.pipeline_mode<synchronous>, transform_indices = @transform_3, window_bounds = array<i64: 256, 128>}, {pipeline_mode = #tpu.pipeline_mode<synchronous>, transform_indices = @transform_4, window_bounds = array<i64: 1, 128>}, {pipeline_mode = #tpu.pipeline_mode<synchronous>, transform_indices = @transform_5, window_bounds = array<i64: 128, 64>}, {pipeline_mode = #tpu.pipeline_mode<synchronous>, transform_indices = @transform_6, window_bounds = array<i64: 1, 64>}, {pipeline_mode = #tpu.pipeline_mode<synchronous>, transform_indices = @transform_7, window_bounds = array<i64: 64, 512>}, {pipeline_mode = #tpu.pipeline_mode<synchronous>, transform_indices = @transform_8, window_bounds = array<i64: 1, 512>}, {transform_indices = @transform_9, window_bounds = array<i64: 8, 512>}]} {
    %c0 = arith.constant 0 : index
    %c0_0 = arith.constant 0 : index
    %0 = vector.load %arg1[%c0, %c0_0] : memref<8x32xbf16, #tpu.memory_space<vmem>>, vector<8x32xbf16>
    %c0_1 = arith.constant 0 : index
    %c0_2 = arith.constant 0 : index
    %1 = vector.load %arg2[%c0_1, %c0_2] : memref<32x256xbf16, #tpu.memory_space<vmem>>, vector<32x256xbf16>
    %cst = arith.constant dense<0.000000e+00> : vector<8x256xf32>
    %2 = tpu.matmul %0, %1, %cst {dimension_numbers = #tpu.dot_dimension_numbers<[1], [0], [0], [1], [0, 0, 1, 1], [], []>} : vector<8x32xbf16>, vector<32x256xbf16>, vector<8x256xf32> -> vector<8x256xf32>
    %c0_3 = arith.constant 0 : index
    %c0_4 = arith.constant 0 : index
    %3 = vector.load %arg3[%c0_3, %c0_4] : memref<1x256xf32, #tpu.memory_space<vmem>>, vector<1x256xf32>
    %4 = vector.broadcast %3 : vector<1x256xf32> to vector<8x256xf32>
    %5 = arith.addf %2, %4 : vector<8x256xf32>
    %cst_5 = arith.constant 0.000000e+00 : f32
    %6 = vector.broadcast %cst_5 : f32 to vector<8x256xf32>
    %7 = arith.maximumf %5, %6 : vector<8x256xf32>
    %8 = arith.truncf %7 : vector<8x256xf32> to vector<8x256xbf16>
    %c0_6 = arith.constant 0 : index
    %c0_7 = arith.constant 0 : index
    %9 = vector.load %arg4[%c0_6, %c0_7] : memref<256x128xbf16, #tpu.memory_space<vmem>>, vector<256x128xbf16>
    %cst_8 = arith.constant dense<0.000000e+00> : vector<8x128xf32>
    %10 = tpu.matmul %8, %9, %cst_8 {dimension_numbers = #tpu.dot_dimension_numbers<[1], [0], [0], [1], [0, 0, 1, 1], [], []>} : vector<8x256xbf16>, vector<256x128xbf16>, vector<8x128xf32> -> vector<8x128xf32>
    %c0_9 = arith.constant 0 : index
    %c0_10 = arith.constant 0 : index
    %11 = vector.load %arg5[%c0_9, %c0_10] : memref<1x128xf32, #tpu.memory_space<vmem>>, vector<1x128xf32>
    %12 = vector.broadcast %11 : vector<1x128xf32> to vector<8x128xf32>
    %13 = arith.addf %10, %12 : vector<8x128xf32>
    %cst_11 = arith.constant 0.000000e+00 : f32
    %14 = vector.broadcast %cst_11 : f32 to vector<8x128xf32>
    %15 = arith.maximumf %13, %14 : vector<8x128xf32>
    %16 = arith.truncf %15 : vector<8x128xf32> to vector<8x128xbf16>
    %c0_12 = arith.constant 0 : index
    %c0_13 = arith.constant 0 : index
    %17 = vector.load %arg6[%c0_12, %c0_13] : memref<128x64xbf16, #tpu.memory_space<vmem>>, vector<128x64xbf16>
    %cst_14 = arith.constant dense<0.000000e+00> : vector<8x64xf32>
    %18 = tpu.matmul %16, %17, %cst_14 {dimension_numbers = #tpu.dot_dimension_numbers<[1], [0], [0], [1], [0, 0, 1, 1], [], []>} : vector<8x128xbf16>, vector<128x64xbf16>, vector<8x64xf32> -> vector<8x64xf32>
    %c0_15 = arith.constant 0 : index
    %c0_16 = arith.constant 0 : index
    %19 = vector.load %arg7[%c0_15, %c0_16] : memref<1x64xf32, #tpu.memory_space<vmem>>, vector<1x64xf32>
    %20 = vector.broadcast %19 : vector<1x64xf32> to vector<8x64xf32>
    %21 = arith.addf %18, %20 : vector<8x64xf32>
    %cst_17 = arith.constant 0.000000e+00 : f32
    %22 = vector.broadcast %cst_17 : f32 to vector<8x64xf32>
    %23 = arith.maximumf %21, %22 : vector<8x64xf32>
    %24 = arith.truncf %23 : vector<8x64xf32> to vector<8x64xbf16>
    %c0_18 = arith.constant 0 : index
    %c0_19 = arith.constant 0 : index
    %25 = vector.load %arg8[%c0_18, %c0_19] : memref<64x512xbf16, #tpu.memory_space<vmem>>, vector<64x512xbf16>
    %cst_20 = arith.constant dense<0.000000e+00> : vector<8x512xf32>
    %26 = tpu.matmul %24, %25, %cst_20 {dimension_numbers = #tpu.dot_dimension_numbers<[1], [0], [0], [1], [0, 0, 1, 1], [], []>} : vector<8x64xbf16>, vector<64x512xbf16>, vector<8x512xf32> -> vector<8x512xf32>
    %c0_21 = arith.constant 0 : index
    %c0_22 = arith.constant 0 : index
    %27 = vector.load %arg9[%c0_21, %c0_22] : memref<1x512xf32, #tpu.memory_space<vmem>>, vector<1x512xf32>
    %28 = vector.broadcast %27 : vector<1x512xf32> to vector<8x512xf32>
    %29 = arith.addf %26, %28 : vector<8x512xf32>
    %c0_23 = arith.constant 0 : index
    %c0_24 = arith.constant 0 : index
    %30 = vector.load %arg10[%c0_23, %c0_24] : memref<8x512xf32, #tpu.memory_space<vmem>>, vector<8x512xf32>
    tpu.vector_store %arg10[%c0_23, %c0_24], %29 {strides = array<i32>} : memref<8x512xf32, #tpu.memory_space<vmem>>, vector<8x512xf32>,
    return
  }
  func.func @transform_0(%arg0: i32) -> (i32, i32) {
    %c0_i32 = arith.constant 0 : i32
    %c0_i32_0 = arith.constant 0 : i32
    return %arg0, %c0_i32 : i32, i32
  }
  func.func @transform_1(%arg0: i32) -> (i32, i32) {
    %c0_i32 = arith.constant 0 : i32
    %c0_i32_0 = arith.constant 0 : i32
    %c0_i32_1 = arith.constant 0 : i32
    return %c0_i32, %c0_i32_0 : i32, i32
  }
  func.func @transform_2(%arg0: i32) -> (i32, i32) {
    %c0_i32 = arith.constant 0 : i32
    %c0_i32_0 = arith.constant 0 : i32
    %c0_i32_1 = arith.constant 0 : i32
    return %c0_i32, %c0_i32_0 : i32, i32
  }
  func.func @transform_3(%arg0: i32) -> (i32, i32) {
    %c0_i32 = arith.constant 0 : i32
    %c0_i32_0 = arith.constant 0 : i32
    %c0_i32_1 = arith.constant 0 : i32
    return %c0_i32, %c0_i32_0 : i32, i32
  }
  func.func @transform_4(%arg0: i32) -> (i32, i32) {
    %c0_i32 = arith.constant 0 : i32
    %c0_i32_0 = arith.constant 0 : i32
    %c0_i32_1 = arith.constant 0 : i32
    return %c0_i32, %c0_i32_0 : i32, i32
  }
  func.func @transform_5(%arg0: i32) -> (i32, i32) {
    %c0_i32 = arith.constant 0 : i32
    %c0_i32_0 = arith.constant 0 : i32
    %c0_i32_1 = arith.constant 0 : i32
    return %c0_i32, %c0_i32_0 : i32, i32
  }
  func.func @transform_6(%arg0: i32) -> (i32, i32) {
    %c0_i32 = arith.constant 0 : i32
    %c0_i32_0 = arith.constant 0 : i32
    %c0_i32_1 = arith.constant 0 : i32
    return %c0_i32, %c0_i32_0 : i32, i32
  }
  func.func @transform_7(%arg0: i32) -> (i32, i32) {
    %c0_i32 = arith.constant 0 : i32
    %c0_i32_0 = arith.constant 0 : i32
    %c0_i32_1 = arith.constant 0 : i32
    return %c0_i32, %c0_i32_0 : i32, i32
  }
  func.func @transform_8(%arg0: i32) -> (i32, i32) {
    %c0_i32 = arith.constant 0 : i32
    %c0_i32_0 = arith.constant 0 : i32
    %c0_i32_1 = arith.constant 0 : i32
    return %c0_i32, %c0_i32_0 : i32, i32
  }
  func.func @transform_9(%arg0: i32) -> (i32, i32) {
    %c0_i32 = arith.constant 0 : i32
    %c0_i32_0 = arith.constant 0 : i32
    return %arg0, %c0_i32 : i32, i32
  }
}

</mosaic_0001>

<bundles_post_ra>
// kernel: decoder_forward.1
= control target key start
LH: loop header
LB: loop body
LE: loop exit
PB: predicated region body
PF: predicated region fallthrough
CT: control target
= control target key end

     0   :  { %14 = vsyncpa [#allocation3], 0  ;;  %s1000_s0 = inlined_call_operand.vmem [shape: bf16[8,32], index: 0, kind: input, shape index: {}]   ;;  %s1001_s1 = inlined_call_operand.vmem [shape: bf16[32,256], index: 1, kind: input, shape index: {}]   ;;  %s1002_s2 = inlined_call_operand.vmem [shape: f32[1,256], index: 2, kind: input, shape index: {}]   ;;  %s1003_s3 = inlined_call_operand.hbm [shape: bf16[256,128], index: 3, kind: input, shape index: {}]   ;;  %s1004_s4 = inlined_call_operand.vmem [shape: f32[1,128], index: 4, kind: input, shape index: {}]   ;;  %s1005_s5 = inlined_call_operand.vmem [shape: bf16[128,64], index: 5, kind: input, shape index: {}]   ;;  %s1006_s6 = inlined_call_operand.vmem [shape: f32[1,64], index: 6, kind: input, shape index: {}]   ;;  %s1007_s7 = inlined_call_operand.hbm [shape: bf16[64,512], index: 7, kind: input, shape index: {}]   ;;  %s1008_s8 = inlined_call_operand.vmem [shape: f32[1,512], index: 8, kind: input, shape index: {}]   ;;  %s1009_s9 = inlined_call_operand.hbm [shape: f32[8,512], index: 9, kind: output, shape index: {}]  }
   0x1   :  { %15 = vsyncpa [#allocation6], 0 }
   0x2   :  { %16 = vsyncpa [#allocation4], 0  ;;  %s27_s11 = sshll.u32 %s1003_s3, 4  ;;  %s871_s12 = smov [#allocation2]   ;;  %s28_s11 = int_to_ptr.hbm [resolvable:$true] %s27_s11 }
   0x3   :  { %s29_s13 = sshll.u32 %s871_s12, 4  ;;  %s46_s16 = sshll.u32 %s1007_s7, 4  ;;  %s30_s13 = int_to_ptr.vmem [resolvable:$true] %s29_s13  ;;  %s47_s16 = int_to_ptr.hbm [resolvable:$true] %s46_s16 }
   0x4   :  { %s872_s17 = smov 64   ;;  %s873_s18 = smov 4  }
   0x5   :  { %35 = dma.hbm_to_vmem [thread:$0]  %s28_s11, 2048, %s30_s13, [#allocation3], %s872_s17, %s872_s17, %s873_s18  }
   0x6   :  { %s874_s19 = smov [#allocation5]   ;;  %s875_s21 = smov 256  }
   0x7   :  { %s48_s20 = sshll.u32 %s874_s19, 4  ;;  %s876_s22 = smov 16   ;;  %s49_s20 = int_to_ptr.vmem [resolvable:$true] %s48_s20 }
   0x8   :  { %54 = dma.hbm_to_vmem [thread:$0]  %s47_s16, 2048, %s49_s20, [#allocation6], %s875_s21, %s875_s21, %s876_s22  }
   0x9   :  { %865 = dma.done.wait [#allocation3], 2048  }
   0xa   :  { %866 = vsyncadd [#allocation3], 4294965248 }
   0xb   :  { %867 = dma.done.wait [#allocation6], 2048  }
   0xc   :  { %868 = vsyncadd [#allocation6], 4294965248  ;;  %v568_v0 = vld [vmem:[%s1001_s1 + $0x10] sm:$0xf]  ;;  %v743_v1 = vld [vmem:[%s1001_s1 + $0x14] sm:$0xf0] }
   0xd   :  { %v742_v2 = vld [vmem:[%s1001_s1 + $0x14] sm:$0xf]  ;;  %v569_v3 = vor.u32 %v743_v1, %v568_v0  ;;  %v570_v4 = vld [vmem:[%s1001_s1 + $0x18] sm:$0xf0]  ;;  %v560_v5 = vld [vmem:[%s1001_s1] sm:$0xf] }
   0xe   :  { %v741_v6 = vld [vmem:[%s1001_s1 + $0x4] sm:$0xf0]  ;;  %v573_v7 = vor.u32 %v742_v2, %v570_v4  ;;  %v740_v8 = vld [vmem:[%s1001_s1 + $0x4] sm:$0xf]  ;;  %v562_v9 = vld [vmem:[%s1001_s1 + $0x8] sm:$0xf0] }
   0xf   :  { %107 = vmatpush.bf16.msra.mxu0 %v569_v3  ;;  %v561_v10 = vor.u32 %v741_v6, %v560_v5  ;;  %v751_v11 = vld [vmem:[#allocation2 + $0x38] sm:$0xff]  ;;  %v565_v13 = vor.u32 %v740_v8, %v562_v9  ;;  %v750_v14 = vld [vmem:[#allocation2 + $0x30] sm:$0xff]  ;;  %vm97_vm0 = vcmask 261120   ;;  %v66_v16 = vld [vmem:[%s1000_s0] sm:$0xf]  ;;  %vm480_vm1 = vcmask 523264  }
  0x10   :  { %v759_v12 = vld [vmem:[#allocation2 + $0x78] sm:$0xff]  ;;  %120 = vmatpush.bf16.msra.mxu1 %v573_v7  ;;  %263 = vmatpush.bf16.msra.mxu2 %v751_v11  ;;  %v758_v15 = vld [vmem:[#allocation2 + $0x70] sm:$0xff]  ;;  %v749_v17 = vld [vmem:[#allocation2 + $0x28] sm:$0xff] }
  0x11   :  { %276 = vmatpush.bf16.msra.mxu3 %v759_v12  ;;  %v757_v18 = vld [vmem:[#allocation2 + $0x68] sm:$0xff]  ;;  %v748_v19 = vld [vmem:[#allocation2 + $0x20] sm:$0xff]  ;;  %v747_v21 = vld [vmem:[#allocation2 + $0x18] sm:$0xff] }
  0x12   :  { %v756_v20 = vld [vmem:[#allocation2 + $0x60] sm:$0xff]  ;;  %v755_v22 = vld [vmem:[#allocation2 + $0x58] sm:$0xff]  ;;  %v746_v23 = vld [vmem:[#allocation2 + $0x10] sm:$0xff] }
  0x13   :  { %108 = vmatpush.bf16.msra.mxu0 %v561_v10  ;;  %v754_v24 = vld [vmem:[#allocation2 + $0x50] sm:$0xff]  ;;  %v745_v25 = vld [vmem:[#allocation2 + $0x8] sm:$0xff]  ;;  %v744_v27 = vld [vmem:[#allocation2] sm:$0xff] }
  0x14   :  { %121 = vmatpush.bf16.msra.mxu1 %v565_v13  ;;  %264 = vmatpush.bf16.msra.mxu2 %v750_v14  ;;  %v753_v26 = vld [vmem:[#allocation2 + $0x48] sm:$0xff]  ;;  %v752_v28 = vld [vmem:[#allocation2 + $0x40] sm:$0xff]  ;;  %v767_v29 = vld [vmem:[%s1005_s5 + $0x38] sm:$0xff] }
  0x15   :  { %277 = vmatpush.bf16.msra.mxu3 %v758_v15  ;;  %v766_v30 = vld [vmem:[%s1005_s5 + $0x30] sm:$0xff]  ;;  %v765_v31 = vld [vmem:[%s1005_s5 + $0x28] sm:$0xff]  ;;  %v764_v32 = vld [vmem:[%s1005_s5 + $0x20] sm:$0xff] }
  0x16   :  { %574 = vmatmul.msk.bf16.vlgmr.msra.gmra.mxu0 %vm97_vm0, %v66_v16  ;;  %v763_v33 = vld [vmem:[%s1005_s5 + $0x18] sm:$0xff]  ;;  %v71_v34 = vld [vmem:[%s1002_s2] sm:$0x3]  ;;  %v762_v35 = vld [vmem:[%s1005_s5 + $0x10] sm:$0xff] }
  0x17   :  { %575 = vmatmul.msk.bf16.vlgmr.msra.gmra.mxu1 %vm97_vm0, %v66_v16  ;;  %359 = vmatpush.bf16.msrb.mxu0 %v767_v29  ;;  %v73_v36 = vperm.slane %v71_v34, 0  ;;  %v74_v37 = vperm.slane %v71_v34, 1  ;;  %v761_v48 = vld [vmem:[%s1005_s5 + $0x8] sm:$0xff]  ;;  %v760_v49 = vld [vmem:[%s1005_s5] sm:$0xff]  ;;  %v782_v51 = vld [vmem:[#allocation5 + $0x6c] sm:$0xf0] }
  0x18   :  { %265 = vmatpush.bf16.msra.mxu2 %v749_v17  ;;  %v722_v50 = vld [vmem:[#allocation5 + $0x60] sm:$0xf]  ;;  %v730_v52 = vld [vmem:[#allocation5 + $0x68] sm:$0xf]  ;;  %v783_v54 = vld [vmem:[#allocation5 + $0x74] sm:$0xf0] }
  0x19   :  { %278 = vmatpush.bf16.msra.mxu3 %v757_v18  ;;  %v723_v53 = vor.u32 %v782_v51, %v722_v50  ;;  %v781_v55 = vld [vmem:[#allocation5 + $0x6c] sm:$0xf]  ;;  %v732_v56 = vld [vmem:[#allocation5 + $0x78] sm:$0xf0]  ;;  %v731_v57 = vor.u32 %v783_v54, %v730_v52  ;;  %v706_v59 = vld [vmem:[#allocation5 + $0x40] sm:$0xf] }
  0x1a   :  { %v735_v58 = vor.u32 %v781_v55, %v732_v56  ;;  %v778_v60 = vld [vmem:[#allocation5 + $0x4c] sm:$0xf0]  ;;  %v714_v61 = vld [vmem:[#allocation5 + $0x48] sm:$0xf]  ;;  %v779_v63 = vld [vmem:[#allocation5 + $0x54] sm:$0xf0] }
  0x1b   :  { %360 = vmatpush.bf16.msrb.mxu0 %v766_v30  ;;  %488 = vmatpush.bf16.msrb.mxu1 %v723_v53  ;;  %v707_v62 = vor.u32 %v778_v60, %v706_v59  ;;  %v777_v0 = vld [vmem:[#allocation5 + $0x4c] sm:$0xf]  ;;  %v716_v1 = vld [vmem:[#allocation5 + $0x58] sm:$0xf0]  ;;  %v715_v2 = vor.u32 %v779_v63, %v714_v61  ;;  %v690_v4 = vld [vmem:[#allocation5 + $0x20] sm:$0xf] }
  0x1c   :  { %266 = vmatpush.bf16.msra.mxu2 %v748_v19  ;;  %v719_v3 = vor.u32 %v777_v0, %v716_v1  ;;  %v774_v5 = vld [vmem:[#allocation5 + $0x2c] sm:$0xf0]  ;;  %v791_v7 = vld [vmem:[%s1004_s4] ss:$0 sm:$0xff]  ;;  %v698_v16 = vld [vmem:[#allocation5 + $0x28] sm:$0xf] }
  0x1d   :  { %279 = vmatpush.bf16.msra.mxu3 %v756_v20  ;;  %v691_v6 = vor.u32 %v774_v5, %v690_v4  ;;  %v775_v17 = vld [vmem:[#allocation5 + $0x34] sm:$0xf0]  ;;  %v773_v18 = vld [vmem:[#allocation5 + $0x2c] sm:$0xf]  ;;  %v700_v20 = vld [vmem:[#allocation5 + $0x38] sm:$0xf0] }
  0x1e   :  { %v699_v19 = vor.u32 %v775_v17, %v698_v16  ;;  %v776_v34 = vld [vmem:[#allocation5 + $0x44] sm:$0xf] }
  0x1f   :  { %361 = vmatpush.bf16.msrb.mxu0 %v765_v31  ;;  %489 = vmatpush.bf16.msrb.mxu1 %v707_v62  ;;  %v780_v31 = vld [vmem:[#allocation5 + $0x64] sm:$0xf] }
  0x20   :  { %267 = vmatpush.bf16.msra.mxu2 %v747_v21  ;;  %v703_v21 = vor.u32 %v773_v18, %v700_v20 }
  0x21   :  { %280 = vmatpush.bf16.msra.mxu3 %v755_v22  ;;  %v674_v22 = vld [vmem:[#allocation5] sm:$0xf] }
  0x23   :  { %362 = vmatpush.bf16.msrb.mxu0 %v764_v32  ;;  %490 = vmatpush.bf16.msrb.mxu1 %v691_v6  ;;  %v724_v32 = vld [vmem:[#allocation5 + $0x70] sm:$0xf0] }
  0x24   :  { %268 = vmatpush.bf16.msra.mxu2 %v746_v23  ;;  %v770_v23 = vld [vmem:[#allocation5 + $0xc] sm:$0xf0] }
  0x25   :  { %281 = vmatpush.bf16.msra.mxu3 %v754_v24  ;;  %v682_v24 = vld [vmem:[#allocation5 + $0x8] sm:$0xf] }
  0x27   :  { %363 = vmatpush.bf16.msrb.mxu0 %v763_v33  ;;  %v727_v33 = vor.u32 %v780_v31, %v724_v32 }
  0x28   :  { %269 = vmatpush.bf16.msra.mxu2 %v745_v25  ;;  %v675_v25 = vor.u32 %v770_v23, %v674_v22 }
  0x29   :  { %282 = vmatpush.bf16.msra.mxu3 %v753_v26  ;;  %v771_v26 = vld [vmem:[#allocation5 + $0x14] sm:$0xf0] }
  0x2a   :  { %v683_v29 = vor.u32 %v771_v26, %v682_v24  ;;  %491 = vmatpush.bf16.msrb.mxu1 %v675_v25 }
  0x2b   :  { %364 = vmatpush.bf16.msrb.mxu0 %v762_v35  ;;  %v708_v35 = vld [vmem:[#allocation5 + $0x50] sm:$0xf0] }
  0x2c   :  { %270 = vmatpush.bf16.msra.mxu2 %v744_v27  ;;  %v769_v27 = vld [vmem:[#allocation5 + $0xc] sm:$0xf] }
  0x2d   :  { %283 = vmatpush.bf16.msra.mxu3 %v752_v28  ;;  %v684_v28 = vld [vmem:[#allocation5 + $0x18] sm:$0xf0] }
  0x2e   :  { %v687_v30 = vor.u32 %v769_v27, %v684_v28  ;;  %501 = vmatpush.bf16.msra.mxu1 %v727_v33 }
  0x2f   :  { %365 = vmatpush.bf16.msrb.mxu0 %v761_v48 }
  0x30   :  { %514 = vmatpush.bf16.msrb.mxu2 %v731_v57 }
  0x31   :  { %527 = vmatpush.bf16.msrb.mxu3 %v735_v58 }
  0x33   :  { %366 = vmatpush.bf16.msrb.mxu0 %v760_v49  ;;  %v390_v49 = vld [vmem:[%s1008_s8] sm:$0xf]  ;;  %s547_s8 = sshll.u32 %s1009_s9, 4  ;;  %s548_s8 = int_to_ptr.hbm [resolvable:$true] %s547_s8 }
  0x34   :  { %515 = vmatpush.bf16.msrb.mxu2 %v715_v2  ;;  %v392_v50 = vperm.slane %v390_v49, 0  ;;  %v394_v53 = vperm.slane %v390_v49, 2  ;;  %v395_v54 = vperm.slane %v390_v49, 3  ;;  %v393_v60 = vperm.slane %v390_v49, 1 }
  0x35   :  { %528 = vmatpush.bf16.msrb.mxu3 %v719_v3 }
  0x38   :  { %516 = vmatpush.bf16.msrb.mxu2 %v699_v19 }
  0x39   :  { %529 = vmatpush.bf16.msrb.mxu3 %v703_v21 }
  0x3c   :  { %517 = vmatpush.bf16.msrb.mxu2 %v683_v29 }
  0x3d   :  { %530 = vmatpush.bf16.msrb.mxu3 %v687_v30 }
  0x93   :  { %v110_v38 = vpop.f32.mrf.mxu0 }
  0x94   :  { %v111_v39 = vadd.f32 %v110_v38, %v73_v36  ;;  %v123_v40 = vpop.f32.mrf.mxu1  ;;  %v711_v36 = vor.u32 %v776_v34, %v708_v35  ;;  %v692_v38 = vld [vmem:[#allocation5 + $0x30] sm:$0xf0] }
  0x95   :  { %v124_v41 = vadd.f32 %v123_v40, %v74_v37  ;;  %v772_v37 = vld [vmem:[#allocation5 + $0x24] sm:$0xf] }
  0x96   :  { %v127_v42 = vmax.f32 %v111_v39, 0.0  ;;  %502 = vmatpush.bf16.msra.mxu1 %v711_v36  ;;  %v695_v39 = vor.u32 %v772_v37, %v692_v38  ;;  %v768_v40 = vld [vmem:[#allocation5 + $0x4] sm:$0xf] }
  0x97   :  { %v128_v43 = vmax.f32 %v124_v41, 0.0  ;;  %v676_v41 = vld [vmem:[#allocation5 + $0x10] sm:$0xf0] }
  0x98   :  { %v129_v44 = vpack.c.bf16 %v127_v42, %v127_v42  ;;  %v679_v42 = vor.u32 %v768_v40, %v676_v41 }
  0x99   :  { %v130_v45 = vpack.c.bf16 %v128_v43, %v128_v43  ;;  %v792_v43 = vld [vmem:[%s1006_s6] ss:$0 sm:$0xff]  ;;  %s877_s6 = smov [#allocation7]  }
  0x9a   :  { %271 = vmatmul.bf16.vlgmr.msra.gmra.mxu2 %v129_v44  ;;  %503 = vmatpush.bf16.msra.mxu1 %v695_v39  ;;  %s545_s14 = sshll.u32 %s877_s6, 4  ;;  %s546_s14 = int_to_ptr.vmem [resolvable:$true] %s545_s14 }
  0x9b   :  { %284 = vmatmul.bf16.vlgmr.msra.gmra.mxu3 %v130_v45  ;;  %v112_v46 = vpop.f32.mrf.mxu0 }
  0x9c   :  { %v125_v47 = vpop.f32.mrf.mxu1 }
  0x9e   :  { %504 = vmatpush.bf16.msra.mxu1 %v679_v42 }
 0x11d   :  { %v272_v8 = vpop.f32.mrf.mxu2 }
 0x11e   :  { %v273_v9 = vadd.f32 %v791_v7, %v272_v8  ;;  %v285_v10 = vpop.f32.mrf.mxu3 }
 0x120   :  { %v286_v11 = vadd.f32 %v285_v10, %v273_v9 }
 0x122   :  { %v289_v12 = vmax.f32 %v286_v11, 0.0 }
 0x124   :  { %v290_v13 = vpack.c.bf16 %v289_v12, %v289_v12 }
 0x125   :  { %v274_v14 = vpop.f32.mrf.mxu2 }
 0x126   :  { %v287_v15 = vpop.f32.mrf.mxu3  ;;  %367 = vmatmul.bf16.vlgmr.msrb.gmra.mxu0 %v290_v13 }
 0x1a3   :  { %v368_v44 = vpop.f32.mrf.mxu0 }
 0x1a4   :  { %v369_v45 = vadd.f32 %v792_v43, %v368_v44 }
 0x1a6   :  { %v372_v46 = vmax.f32 %v369_v45, 0.0 }
 0x1a8   :  { %v373_v47 = vpack.c.bf16 %v372_v46, %v372_v46 }
 0x1aa   :  { %736 = vmatmul.msk.bf16.vlgmr.msrb.gmra.mxu1 %vm480_vm1, %v373_v47  ;;  %738 = vmatmul.msk.bf16.vlgmr.msrb.gmra.mxu2 %vm480_vm1, %v373_v47 }
 0x1ab   :  { %739 = vmatmul.msk.bf16.vlgmr.msrb.gmra.mxu3 %vm480_vm1, %v373_v47  ;;  %v370_v48 = vpop.f32.mrf.mxu0 }
 0x1ba   :  { %737 = vmatmul.msk.bf16.vlgmr.msra.gmra.mxu1 %vm480_vm1, %v373_v47 }
 0x227   :  { %v493_v51 = vpop.f32.mrf.mxu1 }
 0x228   :  { %v494_v52 = vadd.f32 %v493_v51, %v392_v50 }
 0x22a   :  { %536 = vst [vmem:[#allocation7] sm:$0xff] %v494_v52 }
 0x22d   :  { %v519_v55 = vpop.f32.mrf.mxu2 }
 0x22e   :  { %v520_v56 = vadd.f32 %v519_v55, %v394_v53  ;;  %v532_v57 = vpop.f32.mrf.mxu3 }
 0x22f   :  { %v533_v58 = vadd.f32 %v532_v57, %v395_v54  ;;  %v495_v59 = vpop.f32.mrf.mxu1 }
 0x230   :  { %538 = vst [vmem:[#allocation7 + $0x10] sm:$0xff] %v520_v56 }
 0x231   :  { %539 = vst [vmem:[#allocation7 + $0x18] sm:$0xff] %v533_v58 }
 0x235   :  { %v521_v61 = vpop.f32.mrf.mxu2 }
 0x236   :  { %v534_v62 = vpop.f32.mrf.mxu3 }
 0x237   :  { %v506_v63 = vpop.f32.mrf.mxu1 }
 0x238   :  { %v507_v0 = vadd.f32 %v506_v63, %v393_v60 }
 0x23a   :  { %537 = vst [vmem:[#allocation7 + $0x8] sm:$0xff] %v507_v0 }
 0x23b   :  { %550 = dma.vmem_to_hbm [thread:$0]  %s546_s14, 512, %s548_s8, [#allocation4]  }
 0x23f   :  { %v508_v1 = vpop.f32.mrf.mxu1 }
 0x240   :  { %869 = dma.done.wait [#allocation4], 512  }
 0x241   :  { %870 = vsyncadd [#allocation4], 4294966784 }
 0x242   :  { %555 = vsyncpa [#allocation3], 1 }
 0x243   :  { %556 = vsyncpa [#allocation6], 1 }
 0x244   :  { %557 = vsyncpa [#allocation4], 1 }

</bundles_post_ra>
